<compile_context>
chip_gen: v6e
topology: v6e:2x2x1
jax: 0.10.0
libtpu: 0.0.40
codegen_flags: <defaults>
</compile_context>

<pallas_src>
import jax
import jax.numpy as jnp
from jax.experimental import pallas as pl
from jax.experimental.pallas import tpu as pltpu


def _round_up(x, m):
    return ((x + m - 1) // m) * m


def _corr_kernel(a_ref, b_ref, o_ref):
    # a_ref: (1, tj, c)       A tile (j-major, c-minor), already in compute dtype
    # b_ref: (1, c, hw_pad)   full B row for this batch; stays resident across all
    #                         j tiles (index_map constant in ji -> no re-fetch).
    #                         May still be the original input dtype; the cast
    #                         below rides the otherwise-idle VPU.
    # o_ref: (1, tj, hw_pad)  o[0, j, i] = sum_c a[0, j, c] * b[0, c, i]
    a = a_ref[0]                            # (tj, c)
    bm = b_ref[0].astype(a.dtype)           # (c, hw_pad)
    corr = jnp.dot(a, bm, preferred_element_type=jnp.float32)   # f32 MXU accumulation
    o_ref[0] = corr.astype(o_ref.dtype)


def _vmem_tile_bytes(c, hw_pad, tj, a_item, b_item, o_item):
    # Double-buffered (default pipeline depth 2) A tile, resident B row, output tile.
    return (2 * tj * c * a_item) + (2 * c * hw_pad * b_item) + (2 * tj * hw_pad * o_item)


def _pick_tj(hw_pad, *, c, batch, tile_cap, a_item, b_item, o_item, vmem_budget):
    """Largest multiple of 128 dividing hw_pad, <= cap, fitting the VMEM budget."""
    cap = min(tile_cap, hw_pad)
    if batch == 1 and hw_pad >= 256:
        # Keep >= 2 j blocks per batch so both v7x TensorCores (megacore) get work.
        cap = min(cap, hw_pad // 2)
    best = 128
    t = 128
    while t <= cap:
        if hw_pad % t == 0 and _vmem_tile_bytes(c, hw_pad, t, a_item, b_item, o_item) <= vmem_budget:
            best = t
        t += 128
    return best


def feature_correlation_3d(feature_A, feature_B, *,
                           compute_dtype=jnp.bfloat16,
                           out_dtype=jnp.bfloat16,
                           tile_cap=1024,
                           vmem_limit_bytes=32 * 1024 * 1024):
    """Pallas implementation of FeatureCorrelation(shape='3D').forward.

    feature_A, feature_B: (b, c, h, w) arrays (NCHW).
    Returns: (b, h*w, h, w) correlation tensor (same layout as the PyTorch module).

    NOTE ON NUMERICS: by default inputs are fed to the MXU in bf16 (f32
    accumulation) and the output is stored in bf16 — this roughly halves HBM
    traffic on this writeback-bound kernel but differs from the f32 PyTorch
    module.  Pass compute_dtype=None, out_dtype=None for the exact f32 path.
    """
    b, c, h, w = feature_A.shape
    assert feature_B.shape == (b, c, h, w), (feature_A.shape, feature_B.shape)
    hw = h * w
    hw_pad = _round_up(hw, 128)

    cdt = jnp.dtype(compute_dtype) if compute_dtype is not None else jnp.dtype(feature_A.dtype)
    odt = jnp.dtype(out_dtype) if out_dtype is not None else jnp.dtype(feature_A.dtype)

    # A: (b,c,h,w) -transpose(2,3)-> (b,c,w,h) -> (b, hw_j, c) with j = w_A*h + h_A.
    # One HBM pass; XLA fuses transpose + cast + pad into a single copy.
    a_flat = jnp.transpose(feature_A, (0, 3, 2, 1)).astype(cdt).reshape(b, hw, c)
    if hw_pad != hw:
        a_flat = jnp.pad(a_flat, ((0, 0), (0, hw_pad - hw), (0, 0)))

    # B: (b,c,h,w) -> (b, c, hw_i) with i = h_B*w + w_B.
    # When hw is already lane-aligned this is a pure view (no wrapper copy); the
    # compute-dtype cast happens in-kernel.  When padding is needed anyway, the
    # cast is folded into the same pad copy.
    b_flat = feature_B.reshape(b, c, hw)
    if hw_pad != hw:
        b_flat = jnp.pad(b_flat.astype(cdt), ((0, 0), (0, 0), (0, hw_pad - hw)))

    a_item = jnp.dtype(a_flat.dtype).itemsize
    b_item = jnp.dtype(b_flat.dtype).itemsize
    o_item = odt.itemsize

    tj = _pick_tj(hw_pad, c=c, batch=b, tile_cap=tile_cap,
                  a_item=a_item, b_item=b_item, o_item=o_item,
                  vmem_budget=(3 * vmem_limit_bytes) // 4)
    nj = hw_pad // tj

    in_bytes = a_flat.size * a_item + b_flat.size * b_item   # each input streamed once
    out_bytes = b * hw_pad * hw_pad * o_item

    corr = pl.pallas_call(
        _corr_kernel,
        out_shape=jax.ShapeDtypeStruct((b, hw_pad, hw_pad), odt),
        grid_spec=pltpu.PrefetchScalarGridSpec(
            num_scalar_prefetch=0,
            grid=(b, nj),
            in_specs=[
                pl.BlockSpec((1, tj, c), lambda bi, ji: (bi, ji, 0)),
                pl.BlockSpec((1, c, hw_pad), lambda bi, ji: (bi, 0, 0)),   # resident per batch
            ],
            out_specs=pl.BlockSpec((1, tj, hw_pad), lambda bi, ji: (bi, ji, 0)),
        ),
        compiler_params=pltpu.CompilerParams(
            # No reduction grid axis (c stays in-block) -> everything is parallel,
            # so megacore / dual-TC sharding can use the j axis even when b == 1.
            dimension_semantics=("parallel", "parallel"),
            vmem_limit_bytes=vmem_limit_bytes,
        ),
        cost_estimate=pl.CostEstimate(
            flops=2 * b * c * hw_pad * hw_pad,
            transcendentals=0,
            bytes_accessed=in_bytes + out_bytes,
        ),
    )(a_flat, b_flat)   # (b, hw_pad(j), hw_pad(i))

    if hw_pad != hw:
        corr = corr[:, :hw, :hw]
    # out[b, j, h_B, w_B] = corr[b, j, i] with i = h_B*w + w_B  (pure view)
    return corr.reshape(b, hw, h, w)


def _reference_3d(feature_A, feature_B):
    """Pure-JAX replica of the PyTorch forward (for correctness checks)."""
    b, c, h, w = feature_A.shape
    fA = jnp.transpose(feature_A, (0, 1, 3, 2)).reshape(b, c, h * w)
    fB = jnp.transpose(feature_B.reshape(b, c, h * w), (0, 2, 1))
    mul = jnp.einsum("bic,bcj->bij", fB, fA)               # (b, h*w, h*w)
    corr = mul.reshape(b, h, w, h * w)
    corr = jnp.transpose(corr, (0, 1, 3, 2))               # transpose(2,3)
    corr = jnp.transpose(corr, (0, 2, 1, 3))               # transpose(1,2)
    return corr                                            # (b, h*w, h, w)


if __name__ == "__main__":
    # FeatureCorrelation has no learnable parameters; `normalization` / ReLU are
    # unused in the forward pass, so there is nothing to initialize.
    key = jax.random.PRNGKey(0)
    kA, kB = jax.random.split(key)

    # Case 1: b=2, c=4, 16x16 (hw = 256, already lane-aligned).
    b, c, h, w = 2, 4, 16, 16
    feature_A = jax.random.normal(kA, (b, c, h, w), dtype=jnp.float32)
    feature_B = jax.random.normal(kB, (b, c, h, w), dtype=jnp.float32)
    ref = _reference_3d(feature_A, feature_B)

    # 1a) Exact path: f32 all the way, tight tolerance.
    out_exact = jax.block_until_ready(
        feature_correlation_3d(feature_A, feature_B, compute_dtype=None, out_dtype=None))
    assert out_exact.shape == (b, h * w, h, w), out_exact.shape
    assert out_exact.dtype == feature_A.dtype
    assert jnp.allclose(out_exact, ref, atol=1e-4, rtol=1e-4), "f32 mismatch vs reference"

    # 1b) Default fast path: bf16 inputs on the MXU, f32 accumulation, bf16 output.
    out_fast = jax.block_until_ready(feature_correlation_3d(feature_A, feature_B))
    ref_bf16 = _reference_3d(
        feature_A.astype(jnp.bfloat16).astype(jnp.float32),
        feature_B.astype(jnp.bfloat16).astype(jnp.float32),
    )
    assert out_fast.shape == (b, h * w, h, w), out_fast.shape
    assert out_fast.dtype == jnp.bfloat16
    assert jnp.allclose(out_fast.astype(jnp.float32), ref_bf16, atol=5e-2, rtol=5e-2), \
        "bf16 mismatch vs reference"

    # Case 2: b=1, c=4, 15x15 (hw = 225): exercises the lane-padding path and the
    # b==1 "at least 2 j-blocks" rule (hw_pad=256, tj=128, nj=2).
    b2, c2, h2, w2 = 1, 4, 15, 15
    fA2 = jax.random.normal(jax.random.fold_in(kA, 1), (b2, c2, h2, w2), dtype=jnp.float32)
    fB2 = jax.random.normal(jax.random.fold_in(kB, 1), (b2, c2, h2, w2), dtype=jnp.float32)
    ref2 = _reference_3d(fA2, fB2)
    out2 = jax.block_until_ready(
        feature_correlation_3d(fA2, fB2, compute_dtype=None, out_dtype=None))
    assert out2.shape == (b2, h2 * w2, h2, w2), out2.shape
    assert jnp.allclose(out2, ref2, atol=1e-4, rtol=1e-4), "padded-path mismatch vs reference"

    print("KERNEL_OK")
</pallas_src>

<mosaic_0001>
module attributes {stable_mosaic.version = 11 : i64} {
  func.func @_corr_kernel(%arg0: i32, %arg1: i32, %arg2: memref<1x256x4xf32, #tpu.memory_space<vmem>>, %arg3: memref<1x4x256xf32, #tpu.memory_space<vmem>>, %arg4: memref<1x256x256xf32, #tpu.memory_space<vmem>>) attributes {dimension_semantics = [#tpu.dimension_semantics<parallel>, #tpu.dimension_semantics<parallel>], iteration_bounds = array<i64: 2, 1>, scalar_prefetch = 0 : i64, scratch_operands = 0 : i64, tpu.core_type = #tpu.core_type<tc>, window_params = [{transform_indices = @transform_0, window_bounds = array<i64: 1, 256, 4>}, {transform_indices = @transform_1, window_bounds = array<i64: 1, 4, 256>}, {transform_indices = @transform_2, window_bounds = array<i64: 1, 256, 256>}]} {
    %c0 = arith.constant 0 : index
    %c0_0 = arith.constant 0 : index
    %c0_1 = arith.constant 0 : index
    %0 = vector.load %arg2[%c0, %c0_0, %c0_1] : memref<1x256x4xf32, #tpu.memory_space<vmem>>, vector<1x256x4xf32>
    %1 = vector.shape_cast %0 : vector<1x256x4xf32> to vector<256x4xf32>
    %c0_2 = arith.constant 0 : index
    %c0_3 = arith.constant 0 : index
    %c0_4 = arith.constant 0 : index
    %2 = vector.load %arg3[%c0_2, %c0_3, %c0_4] : memref<1x4x256xf32, #tpu.memory_space<vmem>>, vector<1x4x256xf32>
    %3 = vector.shape_cast %2 : vector<1x4x256xf32> to vector<4x256xf32>
    %cst = arith.constant dense<0.000000e+00> : vector<256x256xf32>
    %4 = tpu.matmul %1, %3, %cst {dimension_numbers = #tpu.dot_dimension_numbers<[1], [0], [0], [1], [0, 0, 1, 1], [], []>} : vector<256x4xf32>, vector<4x256xf32>, vector<256x256xf32> -> vector<256x256xf32>
    %c0_5 = arith.constant 0 : index
    %c0_6 = arith.constant 0 : index
    %c0_7 = arith.constant 0 : index
    %5 = vector.load %arg4[%c0_5, %c0_6, %c0_7] : memref<1x256x256xf32, #tpu.memory_space<vmem>>, vector<1x256x256xf32>
    %6 = vector.shape_cast %5 : vector<1x256x256xf32> to vector<256x256xf32>
    %7 = vector.shape_cast %4 : vector<256x256xf32> to vector<1x256x256xf32>
    tpu.vector_store %arg4[%c0_5, %c0_6, %c0_7], %7 {strides = array<i32>} : memref<1x256x256xf32, #tpu.memory_space<vmem>>, vector<1x256x256xf32>,
    return
  }
  func.func @transform_0(%arg0: i32, %arg1: i32) -> (i32, i32, i32) {
    %c0_i32 = arith.constant 0 : i32
    %c0_i32_0 = arith.constant 0 : i32
    return %arg0, %arg1, %c0_i32 : i32, i32, i32
  }
  func.func @transform_1(%arg0: i32, %arg1: i32) -> (i32, i32, i32) {
    %c0_i32 = arith.constant 0 : i32
    %c0_i32_0 = arith.constant 0 : i32
    %c0_i32_1 = arith.constant 0 : i32
    return %arg0, %c0_i32, %c0_i32_0 : i32, i32, i32
  }
  func.func @transform_2(%arg0: i32, %arg1: i32) -> (i32, i32, i32) {
    %c0_i32 = arith.constant 0 : i32
    %c0_i32_0 = arith.constant 0 : i32
    return %arg0, %arg1, %c0_i32 : i32, i32, i32
  }
}

</mosaic_0001>

<bundles_post_ra>
// kernel: tpu_custom_call.1
= control target key start
LH: loop header
LB: loop body
LE: loop exit
PB: predicated region body
PF: predicated region fallthrough
CT: control target
= control target key end

     0   :  { %7 = vsyncpa [#allocation3], 0  ;;  %s1255_s0 = inlined_call_operand.vmem [shape: f32[2,256,4], index: 0, kind: input, shape index: {}]   ;;  %s1256_s1 = inlined_call_operand.vmem [shape: f32[2,4,256], index: 1, kind: input, shape index: {}]   ;;  %s1257_s2 = inlined_call_operand.hbm [shape: f32[2,256,256], index: 2, kind: output, shape index: {}]  }
   0x1   :  { %9 = vsyncpa [#allocation3 + $0x1], 0  ;;  %s969_s9 = smov 0   ;;  %s971_s10 = smov 0  }
   0x2   :  { %s973_s11 = smov 0   ;;  %s975_s12 = smov 0  }
   0x3   :  { %s977_s13 = smov 0   ;;  %s979_s14 = smov 0  }
   0x4 LB: > { %s759_s15 = sadd.s32 4294967295, %s948_s14   ;;  %s760_s16 = sadd.s32 4294967294, %s948_s14   ;;  %s948_s14 = sphi %s979_s14, %s15_s14   ;;  %s944_s13 = sphi %s977_s13, %s1264_s13   ;;  %s940_s12 = sphi %s975_s12, %s1263_s12   ;;  %s936_s11 = sphi %s973_s11, %s1262_s11   ;;  %s932_s10 = sphi %s971_s10, %s1261_s10   ;;  %s928_s9 = sphi %s969_s9, %s1260_s9  }
   0x5   : > { %s27_s17 = sadd.s32 1, %s944_s13  ;;  %s90_s18 = sadd.s32 1, %s936_s11 }
   0x6   : > { %p29_p0 = scmp.ge.s32.totalorder %s27_s17, 2  ;;  %p100_p1 = scmp.ne.s32.totalorder %s936_s11, %s932_s10 }
   0x7   : > { %p101_p2 = scmp.eq.s32.totalorder %s759_s15, 1  ;;  %p106_p3 = scmp.ne.s32.totalorder %s932_s10, %s928_s9 }
   0x8   : > { %s1266_s17 = smov (%p29_p0, %s27_s17), 0  ;;  %p107_p5 = scmp.eq.s32.totalorder %s760_s16, 1 }
   0x9   : > { %p1009_p4 = por %p101_p2, %p100_p1  ;;  %s85_s20 = ssub.s32 %s944_s13, %s1266_s17 }
   0xa   : > { %p763_p6 = scmp.ge.s32.totalorder %s948_s14, 1  ;;  %p88_p7 = scmp.eq.s32.totalorder %s85_s20, 0 }
   0xb   : > { %p1016_p8 = por %p107_p5, %p106_p3  ;;  %p146_p9 = scmp.lt.s32.totalorder %s948_s14, 3 }
   0xc   : > { %s1022_s22 = scalar_select %p88_p7, %s936_s11, %s90_s18  }
   0xd   : > { %p147_p10 = pnand %p763_p6, %p146_p9 }
   0xe   : > { %p178_p11 = scmp.lt.s32.totalorder (!%p147_p10), %s940_s12, 1  ;;  %s174_s4 = sand.u32 (!%p147_p10), 1, %s932_s10  }
   0xf   : > { %150 = sbr.rel (%p147_p10) target bundleno = 298 (0x12a), region = 28  ;;  %s764_s5 = sshll.u32 (!%p147_p10), %s174_s4, 9 }
  0x10   : > { %s1133_s6 = scalar_lea.vmem (!%p147_p10), [#allocation2], %s764_s5  ;;  %s810_s7 = sshll.u32 (!%p147_p10), %s940_s12, 13 }
  0x11   : > { %s668_s8 = sshll.u32 (!%p147_p10), %s1133_s6, 4  ;;  %s1200_s18 = scalar_lea.hbm (!%p147_p10), %s1257_s2, %s810_s7  ;;  %s1202_s8 = int_to_ptr.vmem [resolvable:$true] %s668_s8 }
  0x12   : > { %s872_s20 = scalar_lea.vmem (!%p147_p10), %s1202_s8, 8192 }
  0x13   : > { %p873_p12 = scmp.ne.s32.totalorder (!%p147_p10), %s1202_s8, %s872_s20 }
  0x14   : > { %v950_v0 = vmov 0.0   ;;  %s179_s23 = scalar_select %p178_p11, %s940_s12, 1  ;;  %vm325_vm0 = vcmask 1043456   ;;  %vm228_vm1 = vcmask 31744  }
  0x15   : > { %394 = vmatprep.mubr.f32.mxu0 %v950_v0  ;;  %490 = vmatprep.mubr.f32.mxu1 %v950_v0  ;;  %s1210_s12 = scalar_lea.sflag [#allocation3], %s174_s4  ;;  %p874_p13 = pnand %p873_p12, %p1009_p4 }
  0x16   : > { %s808_s24 = sshll.u32 %s179_s23, 8  ;;  %s809_s25 = sshll.u32 %s179_s23, 3 }
  0x17   : > { %s1031_s28 = scalar_lea.vmem %s1255_s0, %s808_s24  ;;  %s191_s3 = scalar_lea.vmem %s1256_s1, %s809_s25 }
  0x18   : > { %v225_v1 = vld [vmem:[%s191_s3] sm:$0xff]  ;;  %v194_v5 = vld [vmem:[%s1031_s28 + $0x8] sm:$0xff]  ;;  %v195_v7 = vld [vmem:[%s1031_s28 + $0x10] sm:$0xff]  ;;  %p875_p0 = pneg %p874_p13  ;;  %s951_s23 = smov [#allocation2]  }
  0x19   : > { %v227_v2 = vcombine.high %v225_v1, %v225_v1  ;;  %v193_v3 = vld [vmem:[%s1031_s28] sm:$0xff]  ;;  %v210_v6 = vld [vmem:[%s1031_s28 + $0x88] sm:$0xff]  ;;  %v211_v8 = vld [vmem:[%s1031_s28 + $0x90] sm:$0xff]  ;;  %s876_s24 = sshll.u32 %s951_s23, 4  ;;  %s877_s24 = int_to_ptr.vmem [resolvable:$false] %s876_s24 }
  0x1a   : > { %v209_v4 = vld [vmem:[%s1031_s28 + $0x80] sm:$0xff]  ;;  %v196_v9 = vld [vmem:[%s1031_s28 + $0x18] sm:$0xff]  ;;  %v198_v13 = vld [vmem:[%s1031_s28 + $0x28] sm:$0xff]  ;;  %s878_s25 = scalar_lea.vmem %s877_s24, 16384  ;;  %p879_p1 = scmp.lt.s32.totalorder %s1202_s8, %s877_s24 }
  0x1b   : > { %769 = vmatprep.subr.msk.mxu0 %vm325_vm0, %v227_v2  ;;  %811 = vmatprep.subr.msk.mxu1 %vm325_vm0, %v227_v2  ;;  %v212_v10 = vld [vmem:[%s1031_s28 + $0x98] sm:$0xff]  ;;  %v197_v11 = vld [vmem:[%s1031_s28 + $0x20] sm:$0xff]  ;;  %v214_v14 = vld [vmem:[%s1031_s28 + $0xa8] sm:$0xff]  ;;  %p880_p2 = scmp.lt.s32.totalorder %s878_s25, %s872_s20 }
  0x1c   : > { %770 = vmatpush1.msk.msra.mxu0 %vm325_vm0, %v225_v1  ;;  %812 = vmatpush1.msk.msra.mxu1 %vm325_vm0, %v225_v1  ;;  %v213_v12 = vld [vmem:[%s1031_s28 + $0xa0] sm:$0xff]  ;;  %v199_v15 = vld [vmem:[%s1031_s28 + $0x30] sm:$0xff]  ;;  %v200_v17 = vld [vmem:[%s1031_s28 + $0x38] sm:$0xff] }
  0x1d   : > { %771 = vmatmul.mubr.msk.f32.vlgmr.msra.gmra.mxu0 %vm228_vm1, %v193_v3  ;;  %787 = vmatmul.mubr.msk.f32.vlgmr.msra.gmra.mxu1 %vm228_vm1, %v209_v4  ;;  %v215_v16 = vld [vmem:[%s1031_s28 + $0xb0] sm:$0xff]  ;;  %v216_v18 = vld [vmem:[%s1031_s28 + $0xb8] sm:$0xff]  ;;  %v201_v19 = vld [vmem:[%s1031_s28 + $0x40] sm:$0xff]  ;;  %p881_p3 = por %p880_p2, %p879_p1 }
  0x1e   : > { %400 = vmatprep.mubr.f32.mxu0 %v950_v0  ;;  %496 = vmatprep.mubr.f32.mxu1 %v950_v0  ;;  %v217_v20 = vld [vmem:[%s1031_s28 + $0xc0] sm:$0xff]  ;;  %v202_v21 = vld [vmem:[%s1031_s28 + $0x48] sm:$0xff]  ;;  %v203_v23 = vld [vmem:[%s1031_s28 + $0x50] sm:$0xff] }
  0x1f   : > { %v218_v22 = vld [vmem:[%s1031_s28 + $0xc8] sm:$0xff]  ;;  %v219_v24 = vld [vmem:[%s1031_s28 + $0xd0] sm:$0xff]  ;;  %v204_v25 = vld [vmem:[%s1031_s28 + $0x58] sm:$0xff]  ;;  %p882_p5 = pnand %p881_p3, %p875_p0 }
  0x20   : > { %v220_v26 = vld [vmem:[%s1031_s28 + $0xd8] sm:$0xff]  ;;  %v205_v27 = vld [vmem:[%s1031_s28 + $0x60] sm:$0xff]  ;;  %v206_v29 = vld [vmem:[%s1031_s28 + $0x68] sm:$0xff] }
  0x21   : > { %772 = vmatmul.mubr.msk.f32.gmra.mxu0 %vm228_vm1, %v194_v5  ;;  %788 = vmatmul.mubr.msk.f32.gmra.mxu1 %vm228_vm1, %v210_v6  ;;  %v221_v28 = vld [vmem:[%s1031_s28 + $0xe0] sm:$0xff]  ;;  %v222_v30 = vld [vmem:[%s1031_s28 + $0xe8] sm:$0xff]  ;;  %v207_v31 = vld [vmem:[%s1031_s28 + $0x70] sm:$0xff] }
  0x22   : > { %406 = vmatprep.mubr.f32.mxu0 %v950_v0  ;;  %502 = vmatprep.mubr.f32.mxu1 %v950_v0  ;;  %v223_v32 = vld [vmem:[%s1031_s28 + $0xf0] sm:$0xff]  ;;  %v208_v33 = vld [vmem:[%s1031_s28 + $0x78] sm:$0xff] }
  0x23   : > { %v224_v34 = vld [vmem:[%s1031_s28 + $0xf8] sm:$0xff] }
  0x25   : > { %773 = vmatmul.mubr.msk.f32.gmra.mxu0 %vm228_vm1, %v195_v7  ;;  %789 = vmatmul.mubr.msk.f32.gmra.mxu1 %vm228_vm1, %v211_v8 }
  0x26   : > { %412 = vmatprep.mubr.f32.mxu0 %v950_v0  ;;  %508 = vmatprep.mubr.f32.mxu1 %v950_v0 }
  0x29   : > { %774 = vmatmul.mubr.msk.f32.gmra.mxu0 %vm228_vm1, %v196_v9  ;;  %790 = vmatmul.mubr.msk.f32.gmra.mxu1 %vm228_vm1, %v212_v10 }
  0x2a   : > { %418 = vmatprep.mubr.f32.mxu0 %v950_v0  ;;  %514 = vmatprep.mubr.f32.mxu1 %v950_v0 }
  0x2d   : > { %775 = vmatmul.mubr.msk.f32.gmra.mxu0 %vm228_vm1, %v197_v11  ;;  %791 = vmatmul.mubr.msk.f32.gmra.mxu1 %vm228_vm1, %v213_v12 }
  0x2e   : > { %424 = vmatprep.mubr.f32.mxu0 %v950_v0  ;;  %520 = vmatprep.mubr.f32.mxu1 %v950_v0 }
  0x31   : > { %776 = vmatmul.mubr.msk.f32.gmra.mxu0 %vm228_vm1, %v198_v13  ;;  %792 = vmatmul.mubr.msk.f32.gmra.mxu1 %vm228_vm1, %v214_v14 }
  0x32   : > { %430 = vmatprep.mubr.f32.mxu0 %v950_v0  ;;  %526 = vmatprep.mubr.f32.mxu1 %v950_v0 }
  0x35   : > { %777 = vmatmul.mubr.msk.f32.gmra.mxu0 %vm228_vm1, %v199_v15  ;;  %793 = vmatmul.mubr.msk.f32.gmra.mxu1 %vm228_vm1, %v215_v16 }
  0x36   : > { %436 = vmatprep.mubr.f32.mxu0 %v950_v0  ;;  %532 = vmatprep.mubr.f32.mxu1 %v950_v0 }
  0x39   : > { %778 = vmatmul.mubr.msk.f32.gmra.mxu0 %vm228_vm1, %v200_v17  ;;  %794 = vmatmul.mubr.msk.f32.gmra.mxu1 %vm228_vm1, %v216_v18 }
  0x3a   : > { %442 = vmatprep.mubr.f32.mxu0 %v950_v0  ;;  %538 = vmatprep.mubr.f32.mxu1 %v950_v0 }
  0x3d   : > { %779 = vmatmul.mubr.msk.f32.gmra.mxu0 %vm228_vm1, %v201_v19  ;;  %795 = vmatmul.mubr.msk.f32.gmra.mxu1 %vm228_vm1, %v217_v20 }
  0x3e   : > { %448 = vmatprep.mubr.f32.mxu0 %v950_v0  ;;  %544 = vmatprep.mubr.f32.mxu1 %v950_v0 }
  0x41   : > { %780 = vmatmul.mubr.msk.f32.gmra.mxu0 %vm228_vm1, %v202_v21  ;;  %796 = vmatmul.mubr.msk.f32.gmra.mxu1 %vm228_vm1, %v218_v22 }
  0x42   : > { %454 = vmatprep.mubr.f32.mxu0 %v950_v0  ;;  %550 = vmatprep.mubr.f32.mxu1 %v950_v0 }
  0x45   : > { %781 = vmatmul.mubr.msk.f32.gmra.mxu0 %vm228_vm1, %v203_v23  ;;  %797 = vmatmul.mubr.msk.f32.gmra.mxu1 %vm228_vm1, %v219_v24 }
  0x46   : > { %460 = vmatprep.mubr.f32.mxu0 %v950_v0  ;;  %556 = vmatprep.mubr.f32.mxu1 %v950_v0 }
  0x49   : > { %782 = vmatmul.mubr.msk.f32.gmra.mxu0 %vm228_vm1, %v204_v25  ;;  %798 = vmatmul.mubr.msk.f32.gmra.mxu1 %vm228_vm1, %v220_v26 }
  0x4a   : > { %466 = vmatprep.mubr.f32.mxu0 %v950_v0  ;;  %562 = vmatprep.mubr.f32.mxu1 %v950_v0 }
  0x4d   : > { %783 = vmatmul.mubr.msk.f32.gmra.mxu0 %vm228_vm1, %v205_v27  ;;  %799 = vmatmul.mubr.msk.f32.gmra.mxu1 %vm228_vm1, %v221_v28 }
  0x4e   : > { %472 = vmatprep.mubr.f32.mxu0 %v950_v0  ;;  %568 = vmatprep.mubr.f32.mxu1 %v950_v0 }
  0x51   : > { %784 = vmatmul.mubr.msk.f32.gmra.mxu0 %vm228_vm1, %v206_v29  ;;  %800 = vmatmul.mubr.msk.f32.gmra.mxu1 %vm228_vm1, %v222_v30 }
  0x52   : > { %478 = vmatprep.mubr.f32.mxu0 %v950_v0  ;;  %574 = vmatprep.mubr.f32.mxu1 %v950_v0 }
  0x55   : > { %785 = vmatmul.mubr.msk.f32.gmra.mxu0 %vm228_vm1, %v207_v31  ;;  %801 = vmatmul.mubr.msk.f32.gmra.mxu1 %vm228_vm1, %v223_v32 }
  0x56   : > { %484 = vmatprep.mubr.f32.mxu0 %v950_v0  ;;  %580 = vmatprep.mubr.f32.mxu1 %v950_v0 }
  0x59   : > { %786 = vmatmul.mubr.msk.f32.gmra.mxu0 %vm228_vm1, %v208_v33  ;;  %802 = vmatmul.mubr.msk.f32.gmra.mxu1 %vm228_vm1, %v224_v34 }
  0xdd   : > { %v396_v35 = vpop.f32.mrf.mxu0  ;;  %v492_v36 = vpop.f32.mrf.mxu1 }
  0xde   : > { %587 = vst [vmem:[%s1133_s6] sm:$0xff] %v396_v35  ;;  %619 = vst [vmem:[%s1133_s6 + $0x100] sm:$0xff] %v492_v36 }
  0xdf   : > { %v398_v37 = vpop.f32.mrf.mxu0  ;;  %v494_v38 = vpop.f32.mrf.mxu1 }
  0xe0   : > { %588 = vst [vmem:[%s1133_s6 + $0x8] sm:$0xff] %v398_v37  ;;  %620 = vst [vmem:[%s1133_s6 + $0x108] sm:$0xff] %v494_v38 }
  0xe1   : > { %v402_v39 = vpop.f32.mrf.mxu0  ;;  %v498_v40 = vpop.f32.mrf.mxu1 }
  0xe2   : > { %589 = vst [vmem:[%s1133_s6 + $0x10] sm:$0xff] %v402_v39  ;;  %621 = vst [vmem:[%s1133_s6 + $0x110] sm:$0xff] %v498_v40 }
  0xe3   : > { %v404_v41 = vpop.f32.mrf.mxu0  ;;  %v500_v42 = vpop.f32.mrf.mxu1 }
  0xe4   : > { %590 = vst [vmem:[%s1133_s6 + $0x18] sm:$0xff] %v404_v41  ;;  %622 = vst [vmem:[%s1133_s6 + $0x118] sm:$0xff] %v500_v42 }
  0xe5   : > { %v408_v43 = vpop.f32.mrf.mxu0  ;;  %v504_v44 = vpop.f32.mrf.mxu1 }
  0xe6   : > { %591 = vst [vmem:[%s1133_s6 + $0x20] sm:$0xff] %v408_v43  ;;  %623 = vst [vmem:[%s1133_s6 + $0x120] sm:$0xff] %v504_v44 }
  0xe7   : > { %v410_v45 = vpop.f32.mrf.mxu0  ;;  %v506_v46 = vpop.f32.mrf.mxu1 }
  0xe8   : > { %592 = vst [vmem:[%s1133_s6 + $0x28] sm:$0xff] %v410_v45  ;;  %624 = vst [vmem:[%s1133_s6 + $0x128] sm:$0xff] %v506_v46 }
  0xe9   : > { %v414_v47 = vpop.f32.mrf.mxu0  ;;  %v510_v48 = vpop.f32.mrf.mxu1 }
  0xea   : > { %593 = vst [vmem:[%s1133_s6 + $0x30] sm:$0xff] %v414_v47  ;;  %625 = vst [vmem:[%s1133_s6 + $0x130] sm:$0xff] %v510_v48 }
  0xeb   : > { %v416_v49 = vpop.f32.mrf.mxu0  ;;  %v512_v50 = vpop.f32.mrf.mxu1 }
  0xec   : > { %594 = vst [vmem:[%s1133_s6 + $0x38] sm:$0xff] %v416_v49  ;;  %626 = vst [vmem:[%s1133_s6 + $0x138] sm:$0xff] %v512_v50 }
  0xed   : > { %v420_v51 = vpop.f32.mrf.mxu0  ;;  %v516_v52 = vpop.f32.mrf.mxu1 }
  0xee   : > { %595 = vst [vmem:[%s1133_s6 + $0x40] sm:$0xff] %v420_v51  ;;  %627 = vst [vmem:[%s1133_s6 + $0x140] sm:$0xff] %v516_v52 }
  0xef   : > { %v422_v53 = vpop.f32.mrf.mxu0  ;;  %v518_v54 = vpop.f32.mrf.mxu1 }
  0xf0   : > { %596 = vst [vmem:[%s1133_s6 + $0x48] sm:$0xff] %v422_v53  ;;  %628 = vst [vmem:[%s1133_s6 + $0x148] sm:$0xff] %v518_v54 }
  0xf1   : > { %v426_v55 = vpop.f32.mrf.mxu0  ;;  %v522_v56 = vpop.f32.mrf.mxu1 }
  0xf2   : > { %597 = vst [vmem:[%s1133_s6 + $0x50] sm:$0xff] %v426_v55  ;;  %629 = vst [vmem:[%s1133_s6 + $0x150] sm:$0xff] %v522_v56 }
  0xf3   : > { %v428_v57 = vpop.f32.mrf.mxu0  ;;  %v524_v58 = vpop.f32.mrf.mxu1 }
  0xf4   : > { %598 = vst [vmem:[%s1133_s6 + $0x58] sm:$0xff] %v428_v57  ;;  %630 = vst [vmem:[%s1133_s6 + $0x158] sm:$0xff] %v524_v58 }
  0xf5   : > { %v432_v59 = vpop.f32.mrf.mxu0  ;;  %v528_v60 = vpop.f32.mrf.mxu1 }
  0xf6   : > { %599 = vst [vmem:[%s1133_s6 + $0x60] sm:$0xff] %v432_v59  ;;  %631 = vst [vmem:[%s1133_s6 + $0x160] sm:$0xff] %v528_v60 }
  0xf7   : > { %v434_v61 = vpop.f32.mrf.mxu0  ;;  %v530_v62 = vpop.f32.mrf.mxu1 }
  0xf8   : > { %600 = vst [vmem:[%s1133_s6 + $0x68] sm:$0xff] %v434_v61  ;;  %632 = vst [vmem:[%s1133_s6 + $0x168] sm:$0xff] %v530_v62 }
  0xf9   : > { %v438_v63 = vpop.f32.mrf.mxu0  ;;  %v534_v0 = vpop.f32.mrf.mxu1 }
  0xfa   : > { %601 = vst [vmem:[%s1133_s6 + $0x70] sm:$0xff] %v438_v63  ;;  %633 = vst [vmem:[%s1133_s6 + $0x170] sm:$0xff] %v534_v0 }
  0xfb   : > { %v440_v1 = vpop.f32.mrf.mxu0  ;;  %v536_v2 = vpop.f32.mrf.mxu1 }
  0xfc   : > { %602 = vst [vmem:[%s1133_s6 + $0x78] sm:$0xff] %v440_v1  ;;  %634 = vst [vmem:[%s1133_s6 + $0x178] sm:$0xff] %v536_v2 }
  0xfd   : > { %v444_v3 = vpop.f32.mrf.mxu0  ;;  %v540_v4 = vpop.f32.mrf.mxu1 }
  0xfe   : > { %603 = vst [vmem:[%s1133_s6 + $0x80] sm:$0xff] %v444_v3  ;;  %635 = vst [vmem:[%s1133_s6 + $0x180] sm:$0xff] %v540_v4 }
  0xff   : > { %v446_v5 = vpop.f32.mrf.mxu0  ;;  %v542_v6 = vpop.f32.mrf.mxu1 }
 0x100   : > { %604 = vst [vmem:[%s1133_s6 + $0x88] sm:$0xff] %v446_v5  ;;  %636 = vst [vmem:[%s1133_s6 + $0x188] sm:$0xff] %v542_v6 }
 0x101   : > { %v450_v7 = vpop.f32.mrf.mxu0  ;;  %v546_v8 = vpop.f32.mrf.mxu1 }
 0x102   : > { %605 = vst [vmem:[%s1133_s6 + $0x90] sm:$0xff] %v450_v7  ;;  %637 = vst [vmem:[%s1133_s6 + $0x190] sm:$0xff] %v546_v8 }
 0x103   : > { %v452_v9 = vpop.f32.mrf.mxu0  ;;  %v548_v10 = vpop.f32.mrf.mxu1 }
 0x104   : > { %606 = vst [vmem:[%s1133_s6 + $0x98] sm:$0xff] %v452_v9  ;;  %638 = vst [vmem:[%s1133_s6 + $0x198] sm:$0xff] %v548_v10 }
 0x105   : > { %v456_v11 = vpop.f32.mrf.mxu0  ;;  %v552_v12 = vpop.f32.mrf.mxu1 }
 0x106   : > { %607 = vst [vmem:[%s1133_s6 + $0xa0] sm:$0xff] %v456_v11  ;;  %639 = vst [vmem:[%s1133_s6 + $0x1a0] sm:$0xff] %v552_v12 }
 0x107   : > { %v458_v13 = vpop.f32.mrf.mxu0  ;;  %v554_v14 = vpop.f32.mrf.mxu1 }
 0x108   : > { %608 = vst [vmem:[%s1133_s6 + $0xa8] sm:$0xff] %v458_v13  ;;  %640 = vst [vmem:[%s1133_s6 + $0x1a8] sm:$0xff] %v554_v14 }
 0x109   : > { %v462_v15 = vpop.f32.mrf.mxu0  ;;  %v558_v16 = vpop.f32.mrf.mxu1 }
 0x10a   : > { %609 = vst [vmem:[%s1133_s6 + $0xb0] sm:$0xff] %v462_v15  ;;  %641 = vst [vmem:[%s1133_s6 + $0x1b0] sm:$0xff] %v558_v16 }
 0x10b   : > { %v464_v17 = vpop.f32.mrf.mxu0  ;;  %v560_v18 = vpop.f32.mrf.mxu1 }
 0x10c   : > { %610 = vst [vmem:[%s1133_s6 + $0xb8] sm:$0xff] %v464_v17  ;;  %642 = vst [vmem:[%s1133_s6 + $0x1b8] sm:$0xff] %v560_v18 }
 0x10d   : > { %v468_v19 = vpop.f32.mrf.mxu0  ;;  %v564_v20 = vpop.f32.mrf.mxu1 }
 0x10e   : > { %611 = vst [vmem:[%s1133_s6 + $0xc0] sm:$0xff] %v468_v19  ;;  %643 = vst [vmem:[%s1133_s6 + $0x1c0] sm:$0xff] %v564_v20 }
 0x10f   : > { %v470_v21 = vpop.f32.mrf.mxu0  ;;  %v566_v22 = vpop.f32.mrf.mxu1 }
 0x110   : > { %612 = vst [vmem:[%s1133_s6 + $0xc8] sm:$0xff] %v470_v21  ;;  %644 = vst [vmem:[%s1133_s6 + $0x1c8] sm:$0xff] %v566_v22 }
 0x111   : > { %v474_v23 = vpop.f32.mrf.mxu0  ;;  %v570_v24 = vpop.f32.mrf.mxu1 }
 0x112   : > { %613 = vst [vmem:[%s1133_s6 + $0xd0] sm:$0xff] %v474_v23  ;;  %645 = vst [vmem:[%s1133_s6 + $0x1d0] sm:$0xff] %v570_v24 }
 0x113   : > { %v476_v25 = vpop.f32.mrf.mxu0  ;;  %v572_v26 = vpop.f32.mrf.mxu1 }
 0x114   : > { %614 = vst [vmem:[%s1133_s6 + $0xd8] sm:$0xff] %v476_v25  ;;  %646 = vst [vmem:[%s1133_s6 + $0x1d8] sm:$0xff] %v572_v26 }
 0x115   : > { %v480_v27 = vpop.f32.mrf.mxu0  ;;  %v576_v28 = vpop.f32.mrf.mxu1 }
 0x116   : > { %615 = vst [vmem:[%s1133_s6 + $0xe0] sm:$0xff] %v480_v27  ;;  %647 = vst [vmem:[%s1133_s6 + $0x1e0] sm:$0xff] %v576_v28 }
 0x117   : > { %v482_v29 = vpop.f32.mrf.mxu0  ;;  %v578_v30 = vpop.f32.mrf.mxu1 }
 0x118   : > { %616 = vst [vmem:[%s1133_s6 + $0xe8] sm:$0xff] %v482_v29  ;;  %648 = vst [vmem:[%s1133_s6 + $0x1e8] sm:$0xff] %v578_v30 }
 0x119   : > { %v486_v31 = vpop.f32.mrf.mxu0  ;;  %v582_v32 = vpop.f32.mrf.mxu1 }
 0x11a   : > { %617 = vst [vmem:[%s1133_s6 + $0xf0] sm:$0xff] %v486_v31  ;;  %649 = vst [vmem:[%s1133_s6 + $0x1f0] sm:$0xff] %v582_v32 }
 0x11b   : > { %v488_v33 = vpop.f32.mrf.mxu0  ;;  %v584_v34 = vpop.f32.mrf.mxu1 }
 0x11c   : > { %618 = vst [vmem:[%s1133_s6 + $0xf8] sm:$0xff] %v488_v33  ;;  %650 = vst [vmem:[%s1133_s6 + $0x1f8] sm:$0xff] %v584_v34 }
 0x11d   : > { %885 = shalt.err (!%p882_p5)
}
 0x11e   : > { %s886_s26 = scalar_lea.hbm %s1200_s18, 8192  ;;  %s890_s29 = scalar_lea.hbm %s1257_s2, 16384 }
 0x11f   : > { %p887_p6 = scmp.ne.s32.totalorder %s1200_s18, %s886_s26  ;;  %p891_p10 = scmp.lt.s32.totalorder %s1200_s18, %s1257_s2 }
 0x120   : > { %p892_p11 = scmp.lt.s32.totalorder %s890_s29, %s886_s26 }
 0x121   : > { %p888_p7 = pnand %p887_p6, %p1009_p4 }
 0x122   : > { %p893_p12 = por %p892_p11, %p891_p10 }
 0x123   : > { %p889_p9 = pneg %p888_p7 }
 0x125   : > { %p894_p13 = pnand %p893_p12, %p889_p9 }
 0x127   : > { %897 = shalt.err (!%p894_p13)
}
 0x128   : > { %s952_s4 = smov 256   ;;  %s953_s5 = smov 16  }
 0x129   : > { %813 = dma.vmem_to_hbm [thread:$0]  (%p1009_p4), %s1202_s8, 8192, %s1200_s18, %s1210_s12, %s952_s4, %s952_s4, %s953_s5  }
 0x12a PF: > { %p819_p0 = scmp.ge.s32.totalorder %s948_s14, 2  ;;  %s683_s6 = sand.u32 1, %s928_s9  }
 0x12b   : > { %s684_s7 = scalar_lea.sflag [#allocation3], %s683_s6 }
 0x12c   : > { %p816_p1 = pnand %p819_p0, %p1016_p8 }
 0x12e   : > { %p817_p2 = pneg %p816_p1 }
 0x130   : > { %923 = dma.done.wait (%p817_p2), %s684_s7, 8192  }
 0x131   : > { %925 = vsyncadd (%p817_p2), %s684_s7, 4294959104  ;;  %s15_s14 = sadd.s32 1, %s948_s14   ;;  %s1260_s9 = smov %s932_s10 }
 0x132   : > { %p12_p3 = scmp.ge.s32.totalorder %s15_s14, 4   ;;  %s1261_s10 = smov %s936_s11 }
 0x133   : > { %s1262_s11 = smov %s1022_s22  ;;  %s1263_s12 = smov %s944_s13 }
 0x134   : > { %s1264_s13 = smov %s1266_s17  ;;  %14 = sbr.rel (!%p12_p3) target bundleno = 4 (0x4), region = 66 }
 0x139   :  { %689 = vsyncpa [#allocation3], 1 }
 0x13a   :  { %691 = vsyncpa [#allocation3 + $0x1], 1 }

</bundles_post_ra>
